<compile_context>
chip_gen: v7x
topology: tpu7x:2x2x1
jax: 0.10.0
libtpu: 0.0.40
codegen_flags: <defaults>
</compile_context>

<pallas_src>
import numpy as np
import jax
import jax.numpy as jnp
from jax.experimental import pallas as pl
from jax.experimental.pallas import tpu as pltpu


def _conv_out(n, k, s, p, d):
    return (n + 2 * p - d * (k - 1) - 1) // s + 1


def _auto_batch_tile(n, h):
    """Target ~128 MXU rows per matmul; keep >= 2 grid steps when n >= 2."""
    bt = max(1, min(n, 128 // max(1, h)))
    if n >= 2:
        bt = max(1, min(bt, n // 2))
    return bt


# ----------------------------------------------------------------------------
# Fused kernel: all layers for `bt` batch images per grid step.
# ----------------------------------------------------------------------------
def _make_fused_kernel(cfgs, bt):
    L = len(cfgs)

    def kernel(*refs):
        x_ref, m_ref = refs[0], refs[1]
        p_refs = refs[2:2 + 3 * L]
        out_ref = refs[2 + 3 * L]
        scratch = refs[3 + 3 * L:]

        xf = x_ref[...]          # (bt, Hi, Wi*Ci)  flattened-NHWC activations
        msk = m_ref[...]         # (bt, Hi, Wi)     mask

        for l, c in enumerate(cfgs):
            wb_ref, bias_ref, cb_ref = p_refs[3 * l:3 * l + 3]
            xpad_ref, mpad_ref = scratch[2 * l], scratch[2 * l + 1]
            Hi, Wi, Ci = c["Hi"], c["Wi"], c["Ci"]
            Ho, Wo, Co = c["Ho"], c["Wo"], c["Co"]
            k, s, p, d = c["k"], c["s"], c["p"], c["d"]

            # Halo-only zeroing (2p rows, not the whole buffer).  Done every
            # step: scratch is per-core under "parallel" megacore partitioning
            # so a program_id==0 guard would be unsafe on the second core.
            if p > 0:
                xpad_ref[:, 0:p, :] = jnp.zeros((bt, p, Wi * Ci), jnp.float32)
                xpad_ref[:, p + Hi:, :] = jnp.zeros((bt, p, Wi * Ci),
                                                    jnp.float32)
                mpad_ref[:, 0:p, :] = jnp.zeros((bt, p, Wi), jnp.float32)
                mpad_ref[:, p + Hi:, :] = jnp.zeros((bt, p, Wi), jnp.float32)
            xpad_ref[:, p:p + Hi, :] = xf
            mpad_ref[:, p:p + Hi, :] = msk

            # k shifted H-row views, lane-concatenated -> the whole conv is
            # ONE MXU matmul with contraction depth k*Wi*Ci.  (W padding,
            # stride and dilation are folded into the band by the wrapper.)
            xrows = []
            mrows = jnp.zeros((bt * Ho, Wi), jnp.float32)
            for i in range(k):                 # static unroll over tap rows
                if s == 1:
                    xr = xpad_ref[:, i * d:i * d + Ho, :]
                    mr = mpad_ref[:, i * d:i * d + Ho, :]
                else:                          # strided row gather
                    xr = xpad_ref[:, pl.ds(i * d, Ho, s), :]
                    mr = mpad_ref[:, pl.ds(i * d, Ho, s), :]
                xrows.append(xr.reshape(bt * Ho, Wi * Ci))
                mrows = mrows + mr.reshape(bt * Ho, Wi)
            lhs = jnp.concatenate(xrows, axis=-1)        # (bt*Ho, k*Wi*Ci)

            acc = jnp.dot(lhs, wb_ref[...],
                          preferred_element_type=jnp.float32)
            y = jnp.maximum(acc + bias_ref[...], 0.0)    # (bt*Ho, Wo*Co)

            # Single bf16 matmul (bit-exact: small integer values) giving both
            # the channel-broadcast count and the plain count.
            cnts = jnp.round(jnp.dot(mrows.astype(jnp.bfloat16), cb_ref[...],
                                     preferred_element_type=jnp.float32))
            cntb = cnts[:, :Wo * Co]                     # (bt*Ho, Wo*Co)
            cnt = cnts[:, Wo * Co:]                      # (bt*Ho, Wo)
            mwb = jnp.where(cntb > 0.0,
                            pl.reciprocal(jnp.maximum(cntb, 1.0), approx=True),
                            0.0)

            xf = (y * mwb).reshape(bt, Ho, Wo * Co)
            msk = (cnt > 0.0).astype(jnp.float32).reshape(bt, Ho, Wo)

        out_ref[...] = xf

    return kernel


# ----------------------------------------------------------------------------
# Builder: one-time band construction + jitted forward (NCHW in / NCHW out).
# ----------------------------------------------------------------------------
def build_map_conv(params, kernel_sizes, strides, paddings, dilations,
                   height, width, batch_tile=None):
    """Precomputes per-layer banded weights once; returns a jitted forward."""
    cin0 = int(np.asarray(params[0][0]).shape[1])

    cfgs = []
    layer_consts = []
    Hi, Wi, Ci = height, width, cin0
    for (w, b), k, s, p, d in zip(params, kernel_sizes, strides, paddings,
                                  dilations):
        w_np = np.asarray(w, dtype=np.float32)
        b_np = np.asarray(b, dtype=np.float32)
        Co = int(w_np.shape[0])
        Ho = _conv_out(Hi, k, s, p, d)
        Wo = _conv_out(Wi, k, s, p, d)

        # Selection S[j, win, wo] = 1 iff (unpadded) input col `win` feeds
        # output col `wo` through kernel column j (W padding/stride/dilation
        # folded in; out-of-range taps hit the implicit zero pad and drop).
        S = np.zeros((k, Wi, Wo), np.float32)
        for j in range(k):
            for wo in range(Wo):
                win = wo * s + j * d - p
                if 0 <= win < Wi:
                    S[j, win, wo] = 1.0

        # Flattened banded weights so each conv is a single MXU matmul:
        # wband[(i*Wi+win)*Ci+ci, wo*Co+co] = sum_j S[j,win,wo] * w[co,ci,i,j].
        wband = np.einsum("jvw,ocij->ivcwo", S, w_np)
        wband = wband.reshape(k * Wi * Ci, Wo * Co)
        bias_row = np.tile(b_np.reshape(1, Co), (Wo, 1)).reshape(1, Wo * Co)

        # Count bands (all-ones kernel) for the mask conv: channel-broadcast
        # block first so the in-kernel split is a lane-aligned slice; bf16 is
        # bit-exact here (values in {0,1}).
        cband = S.sum(axis=0)                                   # (Wi, Wo)
        cband_all = np.concatenate([np.repeat(cband, Co, axis=1), cband],
                                   axis=1)                      # (Wi, Wo*Co+Wo)

        layer_consts.append((jnp.asarray(wband, dtype=jnp.float32),
                             jnp.asarray(bias_row, dtype=jnp.float32),
                             jnp.asarray(cband_all, dtype=jnp.bfloat16)))
        cfgs.append(dict(Hi=Hi, Wi=Wi, Ci=Ci, Ho=Ho, Wo=Wo, Co=Co,
                         k=k, s=s, p=p, d=d))
        Hi, Wi, Ci = Ho, Wo, Co

    Ho_L, Wo_L, Co_L = Hi, Wi, Ci
    H0, W0, C0 = height, width, cin0

    @jax.jit
    def forward(x, mask):
        N = x.shape[0]
        bt = batch_tile if batch_tile else _auto_batch_tile(N, H0)
        n_pad = -(-N // bt) * bt

        # Single boundary layout change: NCHW -> flattened NHWC (N, H, W*C).
        xf = jnp.transpose(x, (0, 2, 3, 1)).reshape(N, H0, W0 * C0)
        mf = mask.astype(jnp.float32).reshape(N, H0, W0)
        if n_pad != N:
            xf = jnp.pad(xf, ((0, n_pad - N), (0, 0), (0, 0)))
            mf = jnp.pad(mf, ((0, n_pad - N), (0, 0), (0, 0)))

        in_specs = [
            pl.BlockSpec((bt, H0, W0 * C0), lambda n: (n, 0, 0)),
            pl.BlockSpec((bt, H0, W0), lambda n: (n, 0, 0)),
        ]
        inputs = [xf, mf]
        scratch_shapes = []
        for c, (wband, bias_row, cband_all) in zip(cfgs, layer_consts):
            in_specs += [
                pl.BlockSpec(wband.shape, lambda n: (0, 0)),
                pl.BlockSpec(bias_row.shape, lambda n: (0, 0)),
                pl.BlockSpec(cband_all.shape, lambda n: (0, 0)),
            ]
            inputs += [wband, bias_row, cband_all]
            hp = c["Hi"] + 2 * c["p"]
            scratch_shapes += [
                pltpu.VMEM((bt, hp, c["Wi"] * c["Ci"]), jnp.float32),
                pltpu.VMEM((bt, hp, c["Wi"]), jnp.float32),
            ]

        out = pl.pallas_call(
            _make_fused_kernel(cfgs, bt),
            out_shape=jax.ShapeDtypeStruct((n_pad, Ho_L, Wo_L * Co_L),
                                           jnp.float32),
            grid_spec=pltpu.PrefetchScalarGridSpec(
                num_scalar_prefetch=0,
                grid=(n_pad // bt,),
                in_specs=in_specs,
                out_specs=pl.BlockSpec((bt, Ho_L, Wo_L * Co_L),
                                       lambda n: (n, 0, 0)),
                scratch_shapes=scratch_shapes,
            ),
            compiler_params=pltpu.CompilerParams(
                dimension_semantics=("parallel",)),
        )(*inputs)

        # Boundary layout change back to NCHW.
        out = out[:N].reshape(N, Ho_L, Wo_L, Co_L)
        return jnp.transpose(out, (0, 3, 1, 2))

    return forward


# ----------------------------------------------------------------------------
# Pure-JAX reference (mirrors the PyTorch forward) for the correctness check.
# ----------------------------------------------------------------------------
def _reference_forward(x, mask, params, kernel_sizes, strides, paddings,
                       dilations):
    dn = ("NCHW", "OIHW", "NCHW")
    pm = mask.astype(jnp.float32)
    for (w, b), k, s, p, d in zip(params, kernel_sizes, strides, paddings,
                                  dilations):
        y = jax.lax.conv_general_dilated(
            x, w, (s, s), [(p, p), (p, p)], rhs_dilation=(d, d),
            dimension_numbers=dn)
        y = jax.nn.relu(y + b[None, :, None, None])
        ones_k = jnp.ones((1, 1, k, k), jnp.float32)
        cnt = jnp.round(jax.lax.conv_general_dilated(
            pm, ones_k, (s, s), [(p, p), (p, p)], rhs_dilation=(d, d),
            dimension_numbers=dn))
        mw = jnp.where(cnt > 0, 1.0 / cnt, 0.0)
        pm = (mw > 0).astype(jnp.float32)
        x = y * mw
    return x


if __name__ == "__main__":
    # Module config (synthetic, deterministic init)
    input_size = 4
    hidden_sizes = [8, 8]
    kernel_sizes = [3, 3]
    strides = [1, 1]
    paddings = [1, 1]
    dilations = [1, 1]
    H = W = 16

    key = jax.random.PRNGKey(0)
    k_x, k_m, *k_params = jax.random.split(key, 2 + 2 * len(hidden_sizes))

    # Inputs: x NCHW, mask N1HW (binary)
    x = jax.random.normal(k_x, (2, input_size, H, W), dtype=jnp.float32)
    mask = (jax.random.uniform(k_m, (2, 1, H, W)) > 0.3).astype(jnp.float32)

    # Conv2d parameters: weight (Cout, Cin, k, k), bias (Cout,)
    channel_sizes = [input_size] + hidden_sizes
    params = []
    for i, k_sz in enumerate(kernel_sizes):
        cin, cout = channel_sizes[i], channel_sizes[i + 1]
        w = 0.1 * jax.random.normal(k_params[2 * i], (cout, cin, k_sz, k_sz),
                                    dtype=jnp.float32)
        b = 0.1 * jax.random.normal(k_params[2 * i + 1], (cout,),
                                    dtype=jnp.float32)
        params.append((w, b))

    # Bands are built once here (outside the per-call path).
    forward = build_map_conv(params, kernel_sizes, strides, paddings,
                             dilations, H, W)

    out = jax.block_until_ready(forward(x, mask))
    ref = _reference_forward(x, mask, params, kernel_sizes, strides, paddings,
                             dilations)
    assert out.shape == ref.shape
    assert jnp.allclose(out, ref, atol=2e-4, rtol=2e-4), \
        float(jnp.max(jnp.abs(out - ref)))

    # Also exercise the batch-tiled path (bt > 1 -> M = bt*Ho MXU rows).
    xb = jax.random.normal(jax.random.PRNGKey(1), (8, input_size, H, W),
                           dtype=jnp.float32)
    mb = (jax.random.uniform(jax.random.PRNGKey(2), (8, 1, H, W)) > 0.3
          ).astype(jnp.float32)
    outb = jax.block_until_ready(forward(xb, mb))
    refb = _reference_forward(xb, mb, params, kernel_sizes, strides, paddings,
                              dilations)
    assert jnp.allclose(outb, refb, atol=2e-4, rtol=2e-4), \
        float(jnp.max(jnp.abs(outb - refb)))

    print("KERNEL_OK")
</pallas_src>

<mosaic_0001>
module attributes {stable_mosaic.version = 11 : i64} {
  func.func @kernel(%arg0: i32, %arg1: memref<1x16x64xf32, #tpu.memory_space<vmem>>, %arg2: memref<1x16x16xf32, #tpu.memory_space<vmem>>, %arg3: memref<192x128xf32, #tpu.memory_space<vmem>>, %arg4: memref<1x128xf32, #tpu.memory_space<vmem>>, %arg5: memref<16x144xbf16, #tpu.memory_space<vmem>>, %arg6: memref<384x128xf32, #tpu.memory_space<vmem>>, %arg7: memref<1x128xf32, #tpu.memory_space<vmem>>, %arg8: memref<16x144xbf16, #tpu.memory_space<vmem>>, %arg9: memref<1x16x128xf32, #tpu.memory_space<vmem>>, %arg10: memref<1x18x64xf32, #tpu.memory_space<vmem>>, %arg11: memref<1x18x16xf32, #tpu.memory_space<vmem>>, %arg12: memref<1x18x128xf32, #tpu.memory_space<vmem>>, %arg13: memref<1x18x16xf32, #tpu.memory_space<vmem>>) attributes {dimension_semantics = [#tpu.dimension_semantics<parallel>], iteration_bounds = array<i64: 2>, scalar_prefetch = 0 : i64, scratch_operands = 4 : i64, tpu.core_type = #tpu.core_type<tc>, window_params = [{transform_indices = @transform_0, window_bounds = array<i64: 1, 16, 64>}, {transform_indices = @transform_1, window_bounds = array<i64: 1, 16, 16>}, {pipeline_mode = #tpu.pipeline_mode<synchronous>, transform_indices = @transform_2, window_bounds = array<i64: 192, 128>}, {pipeline_mode = #tpu.pipeline_mode<synchronous>, transform_indices = @transform_3, window_bounds = array<i64: 1, 128>}, {pipeline_mode = #tpu.pipeline_mode<synchronous>, transform_indices = @transform_4, window_bounds = array<i64: 16, 144>}, {pipeline_mode = #tpu.pipeline_mode<synchronous>, transform_indices = @transform_5, window_bounds = array<i64: 384, 128>}, {pipeline_mode = #tpu.pipeline_mode<synchronous>, transform_indices = @transform_6, window_bounds = array<i64: 1, 128>}, {pipeline_mode = #tpu.pipeline_mode<synchronous>, transform_indices = @transform_7, window_bounds = array<i64: 16, 144>}, {transform_indices = @transform_8, window_bounds = array<i64: 1, 16, 128>}]} {
    %c0 = arith.constant 0 : index
    %c0_0 = arith.constant 0 : index
    %c0_1 = arith.constant 0 : index
    %0 = vector.load %arg1[%c0, %c0_0, %c0_1] : memref<1x16x64xf32, #tpu.memory_space<vmem>>, vector<1x16x64xf32>
    %c0_2 = arith.constant 0 : index
    %c0_3 = arith.constant 0 : index
    %c0_4 = arith.constant 0 : index
    %1 = vector.load %arg2[%c0_2, %c0_3, %c0_4] : memref<1x16x16xf32, #tpu.memory_space<vmem>>, vector<1x16x16xf32>
    %cst = arith.constant 0.000000e+00 : f32
    %2 = vector.broadcast %cst : f32 to vector<1x1x64xf32>
    %c0_5 = arith.constant 0 : index
    %c0_6 = arith.constant 0 : index
    %c0_7 = arith.constant 0 : index
    %3 = vector.load %arg10[%c0_5, %c0_6, %c0_7] : memref<1x18x64xf32, #tpu.memory_space<vmem>>, vector<1x1x64xf32>
    tpu.vector_store %arg10[%c0_5, %c0_6, %c0_7], %2 {strides = array<i32>} : memref<1x18x64xf32, #tpu.memory_space<vmem>>, vector<1x1x64xf32>,
    %cst_8 = arith.constant 0.000000e+00 : f32
    %4 = vector.broadcast %cst_8 : f32 to vector<1x1x64xf32>
    %c0_9 = arith.constant 0 : index
    %c17 = arith.constant 17 : index
    %c0_10 = arith.constant 0 : index
    %5 = vector.load %arg10[%c0_9, %c17, %c0_10] : memref<1x18x64xf32, #tpu.memory_space<vmem>>, vector<1x1x64xf32>
    tpu.vector_store %arg10[%c0_9, %c17, %c0_10], %4 {strides = array<i32>} : memref<1x18x64xf32, #tpu.memory_space<vmem>>, vector<1x1x64xf32>,
    %cst_11 = arith.constant 0.000000e+00 : f32
    %6 = vector.broadcast %cst_11 : f32 to vector<1x1x16xf32>
    %c0_12 = arith.constant 0 : index
    %c0_13 = arith.constant 0 : index
    %c0_14 = arith.constant 0 : index
    %7 = vector.load %arg11[%c0_12, %c0_13, %c0_14] : memref<1x18x16xf32, #tpu.memory_space<vmem>>, vector<1x1x16xf32>
    tpu.vector_store %arg11[%c0_12, %c0_13, %c0_14], %6 {strides = array<i32>} : memref<1x18x16xf32, #tpu.memory_space<vmem>>, vector<1x1x16xf32>,
    %cst_15 = arith.constant 0.000000e+00 : f32
    %8 = vector.broadcast %cst_15 : f32 to vector<1x1x16xf32>
    %c0_16 = arith.constant 0 : index
    %c17_17 = arith.constant 17 : index
    %c0_18 = arith.constant 0 : index
    %9 = vector.load %arg11[%c0_16, %c17_17, %c0_18] : memref<1x18x16xf32, #tpu.memory_space<vmem>>, vector<1x1x16xf32>
    tpu.vector_store %arg11[%c0_16, %c17_17, %c0_18], %8 {strides = array<i32>} : memref<1x18x16xf32, #tpu.memory_space<vmem>>, vector<1x1x16xf32>,
    %c0_19 = arith.constant 0 : index
    %c1 = arith.constant 1 : index
    %c0_20 = arith.constant 0 : index
    %10 = vector.load %arg10[%c0_19, %c1, %c0_20] : memref<1x18x64xf32, #tpu.memory_space<vmem>>, vector<1x16x64xf32>
    tpu.vector_store %arg10[%c0_19, %c1, %c0_20], %0 {strides = array<i32>} : memref<1x18x64xf32, #tpu.memory_space<vmem>>, vector<1x16x64xf32>,
    %c0_21 = arith.constant 0 : index
    %c1_22 = arith.constant 1 : index
    %c0_23 = arith.constant 0 : index
    %11 = vector.load %arg11[%c0_21, %c1_22, %c0_23] : memref<1x18x16xf32, #tpu.memory_space<vmem>>, vector<1x16x16xf32>
    tpu.vector_store %arg11[%c0_21, %c1_22, %c0_23], %1 {strides = array<i32>} : memref<1x18x16xf32, #tpu.memory_space<vmem>>, vector<1x16x16xf32>,
    %cst_24 = arith.constant 0.000000e+00 : f32
    %12 = vector.broadcast %cst_24 : f32 to vector<16x16xf32>
    %c0_25 = arith.constant 0 : index
    %c0_26 = arith.constant 0 : index
    %c0_27 = arith.constant 0 : index
    %13 = vector.load %arg10[%c0_25, %c0_26, %c0_27] : memref<1x18x64xf32, #tpu.memory_space<vmem>>, vector<1x16x64xf32>
    %c0_28 = arith.constant 0 : index
    %c0_29 = arith.constant 0 : index
    %c0_30 = arith.constant 0 : index
    %14 = vector.load %arg11[%c0_28, %c0_29, %c0_30] : memref<1x18x16xf32, #tpu.memory_space<vmem>>, vector<1x16x16xf32>
    %15 = vector.shape_cast %13 : vector<1x16x64xf32> to vector<16x64xf32>
    %16 = vector.shape_cast %14 : vector<1x16x16xf32> to vector<16x16xf32>
    %17 = arith.addf %12, %16 : vector<16x16xf32>
    %c0_31 = arith.constant 0 : index
    %c1_32 = arith.constant 1 : index
    %c0_33 = arith.constant 0 : index
    %18 = vector.load %arg10[%c0_31, %c1_32, %c0_33] : memref<1x18x64xf32, #tpu.memory_space<vmem>>, vector<1x16x64xf32>
    %c0_34 = arith.constant 0 : index
    %c1_35 = arith.constant 1 : index
    %c0_36 = arith.constant 0 : index
    %19 = vector.load %arg11[%c0_34, %c1_35, %c0_36] : memref<1x18x16xf32, #tpu.memory_space<vmem>>, vector<1x16x16xf32>
    %20 = vector.shape_cast %18 : vector<1x16x64xf32> to vector<16x64xf32>
    %21 = vector.shape_cast %19 : vector<1x16x16xf32> to vector<16x16xf32>
    %22 = arith.addf %17, %21 : vector<16x16xf32>
    %c0_37 = arith.constant 0 : index
    %c2 = arith.constant 2 : index
    %c0_38 = arith.constant 0 : index
    %23 = vector.load %arg10[%c0_37, %c2, %c0_38] : memref<1x18x64xf32, #tpu.memory_space<vmem>>, vector<1x16x64xf32>
    %c0_39 = arith.constant 0 : index
    %c2_40 = arith.constant 2 : index
    %c0_41 = arith.constant 0 : index
    %24 = vector.load %arg11[%c0_39, %c2_40, %c0_41] : memref<1x18x16xf32, #tpu.memory_space<vmem>>, vector<1x16x16xf32>
    %25 = vector.shape_cast %23 : vector<1x16x64xf32> to vector<16x64xf32>
    %26 = vector.shape_cast %24 : vector<1x16x16xf32> to vector<16x16xf32>
    %27 = arith.addf %22, %26 : vector<16x16xf32>
    %28 = tpu.concatenate %15, %20, %25 in 1 : vector<16x64xf32>, vector<16x64xf32>, vector<16x64xf32> -> vector<16x192xf32>
    %c0_42 = arith.constant 0 : index
    %c0_43 = arith.constant 0 : index
    %29 = vector.load %arg3[%c0_42, %c0_43] : memref<192x128xf32, #tpu.memory_space<vmem>>, vector<192x128xf32>
    %cst_44 = arith.constant dense<0.000000e+00> : vector<16x128xf32>
    %30 = tpu.matmul %28, %29, %cst_44 {dimension_numbers = #tpu.dot_dimension_numbers<[1], [0], [0], [1], [0, 0, 1, 1], [], []>} : vector<16x192xf32>, vector<192x128xf32>, vector<16x128xf32> -> vector<16x128xf32>
    %c0_45 = arith.constant 0 : index
    %c0_46 = arith.constant 0 : index
    %31 = vector.load %arg4[%c0_45, %c0_46] : memref<1x128xf32, #tpu.memory_space<vmem>>, vector<1x128xf32>
    %32 = vector.broadcast %31 : vector<1x128xf32> to vector<16x128xf32>
    %33 = arith.addf %30, %32 : vector<16x128xf32>
    %cst_47 = arith.constant 0.000000e+00 : f32
    %34 = vector.broadcast %cst_47 : f32 to vector<16x128xf32>
    %35 = arith.maximumf %33, %34 : vector<16x128xf32>
    %36 = arith.truncf %27 : vector<16x16xf32> to vector<16x16xbf16>
    %c0_48 = arith.constant 0 : index
    %c0_49 = arith.constant 0 : index
    %37 = vector.load %arg5[%c0_48, %c0_49] : memref<16x144xbf16, #tpu.memory_space<vmem>>, vector<16x144xbf16>
    %cst_50 = arith.constant dense<0.000000e+00> : vector<16x144xf32>
    %38 = tpu.matmul %36, %37, %cst_50 {dimension_numbers = #tpu.dot_dimension_numbers<[1], [0], [0], [1], [0, 0, 1, 1], [], []>} : vector<16x16xbf16>, vector<16x144xbf16>, vector<16x144xf32> -> vector<16x144xf32>
    %39 = math.roundeven %38 : vector<16x144xf32>
    %40 = vector.extract_strided_slice %39 {offsets = [0, 0], sizes = [16, 128], strides = [1, 1]} : vector<16x144xf32> to vector<16x128xf32>
    %41 = vector.extract_strided_slice %39 {offsets = [0, 128], sizes = [16, 16], strides = [1, 1]} : vector<16x144xf32> to vector<16x16xf32>
    %cst_51 = arith.constant 0.000000e+00 : f32
    %42 = vector.broadcast %cst_51 : f32 to vector<16x128xf32>
    %43 = arith.cmpf ogt, %40, %42 : vector<16x128xf32>
    %cst_52 = arith.constant 1.000000e+00 : f32
    %44 = vector.broadcast %cst_52 : f32 to vector<16x128xf32>
    %45 = arith.maximumf %40, %44 : vector<16x128xf32>
    %46 = tpu.reciprocal %45 {approx = true} : vector<16x128xf32> -> vector<16x128xf32>
    %cst_53 = arith.constant 0.000000e+00 : f32
    %47 = vector.broadcast %cst_53 : f32 to vector<16x128xf32>
    %48 = arith.select %43, %46, %47 : vector<16x128xi1>, vector<16x128xf32>
    %49 = arith.mulf %35, %48 : vector<16x128xf32>
    %50 = vector.shape_cast %49 : vector<16x128xf32> to vector<1x16x128xf32>
    %cst_54 = arith.constant 0.000000e+00 : f32
    %51 = vector.broadcast %cst_54 : f32 to vector<16x16xf32>
    %52 = arith.cmpf ogt, %41, %51 : vector<16x16xf32>
    %53 = arith.extui %52 : vector<16x16xi1> to vector<16x16xi32>
    %54 = arith.sitofp %53 : vector<16x16xi32> to vector<16x16xf32>
    %55 = vector.shape_cast %54 : vector<16x16xf32> to vector<1x16x16xf32>
    %cst_55 = arith.constant 0.000000e+00 : f32
    %56 = vector.broadcast %cst_55 : f32 to vector<1x1x128xf32>
    %c0_56 = arith.constant 0 : index
    %c0_57 = arith.constant 0 : index
    %c0_58 = arith.constant 0 : index
    %57 = vector.load %arg12[%c0_56, %c0_57, %c0_58] : memref<1x18x128xf32, #tpu.memory_space<vmem>>, vector<1x1x128xf32>
    tpu.vector_store %arg12[%c0_56, %c0_57, %c0_58], %56 {strides = array<i32>} : memref<1x18x128xf32, #tpu.memory_space<vmem>>, vector<1x1x128xf32>,
    %cst_59 = arith.constant 0.000000e+00 : f32
    %58 = vector.broadcast %cst_59 : f32 to vector<1x1x128xf32>
    %c0_60 = arith.constant 0 : index
    %c17_61 = arith.constant 17 : index
    %c0_62 = arith.constant 0 : index
    %59 = vector.load %arg12[%c0_60, %c17_61, %c0_62] : memref<1x18x128xf32, #tpu.memory_space<vmem>>, vector<1x1x128xf32>
    tpu.vector_store %arg12[%c0_60, %c17_61, %c0_62], %58 {strides = array<i32>} : memref<1x18x128xf32, #tpu.memory_space<vmem>>, vector<1x1x128xf32>,
    %cst_63 = arith.constant 0.000000e+00 : f32
    %60 = vector.broadcast %cst_63 : f32 to vector<1x1x16xf32>
    %c0_64 = arith.constant 0 : index
    %c0_65 = arith.constant 0 : index
    %c0_66 = arith.constant 0 : index
    %61 = vector.load %arg13[%c0_64, %c0_65, %c0_66] : memref<1x18x16xf32, #tpu.memory_space<vmem>>, vector<1x1x16xf32>
    tpu.vector_store %arg13[%c0_64, %c0_65, %c0_66], %60 {strides = array<i32>} : memref<1x18x16xf32, #tpu.memory_space<vmem>>, vector<1x1x16xf32>,
    %cst_67 = arith.constant 0.000000e+00 : f32
    %62 = vector.broadcast %cst_67 : f32 to vector<1x1x16xf32>
    %c0_68 = arith.constant 0 : index
    %c17_69 = arith.constant 17 : index
    %c0_70 = arith.constant 0 : index
    %63 = vector.load %arg13[%c0_68, %c17_69, %c0_70] : memref<1x18x16xf32, #tpu.memory_space<vmem>>, vector<1x1x16xf32>
    tpu.vector_store %arg13[%c0_68, %c17_69, %c0_70], %62 {strides = array<i32>} : memref<1x18x16xf32, #tpu.memory_space<vmem>>, vector<1x1x16xf32>,
    %c0_71 = arith.constant 0 : index
    %c1_72 = arith.constant 1 : index
    %c0_73 = arith.constant 0 : index
    %64 = vector.load %arg12[%c0_71, %c1_72, %c0_73] : memref<1x18x128xf32, #tpu.memory_space<vmem>>, vector<1x16x128xf32>
    tpu.vector_store %arg12[%c0_71, %c1_72, %c0_73], %50 {strides = array<i32>} : memref<1x18x128xf32, #tpu.memory_space<vmem>>, vector<1x16x128xf32>,
    %c0_74 = arith.constant 0 : index
    %c1_75 = arith.constant 1 : index
    %c0_76 = arith.constant 0 : index
    %65 = vector.load %arg13[%c0_74, %c1_75, %c0_76] : memref<1x18x16xf32, #tpu.memory_space<vmem>>, vector<1x16x16xf32>
    tpu.vector_store %arg13[%c0_74, %c1_75, %c0_76], %55 {strides = array<i32>} : memref<1x18x16xf32, #tpu.memory_space<vmem>>, vector<1x16x16xf32>,
    %cst_77 = arith.constant 0.000000e+00 : f32
    %66 = vector.broadcast %cst_77 : f32 to vector<16x16xf32>
    %c0_78 = arith.constant 0 : index
    %c0_79 = arith.constant 0 : index
    %c0_80 = arith.constant 0 : index
    %67 = vector.load %arg12[%c0_78, %c0_79, %c0_80] : memref<1x18x128xf32, #tpu.memory_space<vmem>>, vector<1x16x128xf32>
    %c0_81 = arith.constant 0 : index
    %c0_82 = arith.constant 0 : index
    %c0_83 = arith.constant 0 : index
    %68 = vector.load %arg13[%c0_81, %c0_82, %c0_83] : memref<1x18x16xf32, #tpu.memory_space<vmem>>, vector<1x16x16xf32>
    %69 = vector.shape_cast %67 : vector<1x16x128xf32> to vector<16x128xf32>
    %70 = vector.shape_cast %68 : vector<1x16x16xf32> to vector<16x16xf32>
    %71 = arith.addf %66, %70 : vector<16x16xf32>
    %c0_84 = arith.constant 0 : index
    %c1_85 = arith.constant 1 : index
    %c0_86 = arith.constant 0 : index
    %72 = vector.load %arg12[%c0_84, %c1_85, %c0_86] : memref<1x18x128xf32, #tpu.memory_space<vmem>>, vector<1x16x128xf32>
    %c0_87 = arith.constant 0 : index
    %c1_88 = arith.constant 1 : index
    %c0_89 = arith.constant 0 : index
    %73 = vector.load %arg13[%c0_87, %c1_88, %c0_89] : memref<1x18x16xf32, #tpu.memory_space<vmem>>, vector<1x16x16xf32>
    %74 = vector.shape_cast %72 : vector<1x16x128xf32> to vector<16x128xf32>
    %75 = vector.shape_cast %73 : vector<1x16x16xf32> to vector<16x16xf32>
    %76 = arith.addf %71, %75 : vector<16x16xf32>
    %c0_90 = arith.constant 0 : index
    %c2_91 = arith.constant 2 : index
    %c0_92 = arith.constant 0 : index
    %77 = vector.load %arg12[%c0_90, %c2_91, %c0_92] : memref<1x18x128xf32, #tpu.memory_space<vmem>>, vector<1x16x128xf32>
    %c0_93 = arith.constant 0 : index
    %c2_94 = arith.constant 2 : index
    %c0_95 = arith.constant 0 : index
    %78 = vector.load %arg13[%c0_93, %c2_94, %c0_95] : memref<1x18x16xf32, #tpu.memory_space<vmem>>, vector<1x16x16xf32>
    %79 = vector.shape_cast %77 : vector<1x16x128xf32> to vector<16x128xf32>
    %80 = vector.shape_cast %78 : vector<1x16x16xf32> to vector<16x16xf32>
    %81 = arith.addf %76, %80 : vector<16x16xf32>
    %82 = tpu.concatenate %69, %74, %79 in 1 : vector<16x128xf32>, vector<16x128xf32>, vector<16x128xf32> -> vector<16x384xf32>
    %c0_96 = arith.constant 0 : index
    %c0_97 = arith.constant 0 : index
    %83 = vector.load %arg6[%c0_96, %c0_97] : memref<384x128xf32, #tpu.memory_space<vmem>>, vector<384x128xf32>
    %cst_98 = arith.constant dense<0.000000e+00> : vector<16x128xf32>
    %84 = tpu.matmul %82, %83, %cst_98 {dimension_numbers = #tpu.dot_dimension_numbers<[1], [0], [0], [1], [0, 0, 1, 1], [], []>} : vector<16x384xf32>, vector<384x128xf32>, vector<16x128xf32> -> vector<16x128xf32>
    %c0_99 = arith.constant 0 : index
    %c0_100 = arith.constant 0 : index
    %85 = vector.load %arg7[%c0_99, %c0_100] : memref<1x128xf32, #tpu.memory_space<vmem>>, vector<1x128xf32>
    %86 = vector.broadcast %85 : vector<1x128xf32> to vector<16x128xf32>
    %87 = arith.addf %84, %86 : vector<16x128xf32>
    %cst_101 = arith.constant 0.000000e+00 : f32
    %88 = vector.broadcast %cst_101 : f32 to vector<16x128xf32>
    %89 = arith.maximumf %87, %88 : vector<16x128xf32>
    %90 = arith.truncf %81 : vector<16x16xf32> to vector<16x16xbf16>
    %c0_102 = arith.constant 0 : index
    %c0_103 = arith.constant 0 : index
    %91 = vector.load %arg8[%c0_102, %c0_103] : memref<16x144xbf16, #tpu.memory_space<vmem>>, vector<16x144xbf16>
    %cst_104 = arith.constant dense<0.000000e+00> : vector<16x144xf32>
    %92 = tpu.matmul %90, %91, %cst_104 {dimension_numbers = #tpu.dot_dimension_numbers<[1], [0], [0], [1], [0, 0, 1, 1], [], []>} : vector<16x16xbf16>, vector<16x144xbf16>, vector<16x144xf32> -> vector<16x144xf32>
    %93 = math.roundeven %92 : vector<16x144xf32>
    %94 = vector.extract_strided_slice %93 {offsets = [0, 0], sizes = [16, 128], strides = [1, 1]} : vector<16x144xf32> to vector<16x128xf32>
    %cst_105 = arith.constant 0.000000e+00 : f32
    %95 = vector.broadcast %cst_105 : f32 to vector<16x128xf32>
    %96 = arith.cmpf ogt, %94, %95 : vector<16x128xf32>
    %cst_106 = arith.constant 1.000000e+00 : f32
    %97 = vector.broadcast %cst_106 : f32 to vector<16x128xf32>
    %98 = arith.maximumf %94, %97 : vector<16x128xf32>
    %99 = tpu.reciprocal %98 {approx = true} : vector<16x128xf32> -> vector<16x128xf32>
    %cst_107 = arith.constant 0.000000e+00 : f32
    %100 = vector.broadcast %cst_107 : f32 to vector<16x128xf32>
    %101 = arith.select %96, %99, %100 : vector<16x128xi1>, vector<16x128xf32>
    %102 = arith.mulf %89, %101 : vector<16x128xf32>
    %103 = vector.shape_cast %102 : vector<16x128xf32> to vector<1x16x128xf32>
    %c0_108 = arith.constant 0 : index
    %c0_109 = arith.constant 0 : index
    %c0_110 = arith.constant 0 : index
    %104 = vector.load %arg9[%c0_108, %c0_109, %c0_110] : memref<1x16x128xf32, #tpu.memory_space<vmem>>, vector<1x16x128xf32>
    tpu.vector_store %arg9[%c0_108, %c0_109, %c0_110], %103 {strides = array<i32>} : memref<1x16x128xf32, #tpu.memory_space<vmem>>, vector<1x16x128xf32>,
    return
  }
  func.func @transform_0(%arg0: i32) -> (i32, i32, i32) {
    %c0_i32 = arith.constant 0 : i32
    %c0_i32_0 = arith.constant 0 : i32
    %c0_i32_1 = arith.constant 0 : i32
    return %arg0, %c0_i32, %c0_i32_0 : i32, i32, i32
  }
  func.func @transform_1(%arg0: i32) -> (i32, i32, i32) {
    %c0_i32 = arith.constant 0 : i32
    %c0_i32_0 = arith.constant 0 : i32
    %c0_i32_1 = arith.constant 0 : i32
    return %arg0, %c0_i32, %c0_i32_0 : i32, i32, i32
  }
  func.func @transform_2(%arg0: i32) -> (i32, i32) {
    %c0_i32 = arith.constant 0 : i32
    %c0_i32_0 = arith.constant 0 : i32
    %c0_i32_1 = arith.constant 0 : i32
    return %c0_i32, %c0_i32_0 : i32, i32
  }
  func.func @transform_3(%arg0: i32) -> (i32, i32) {
    %c0_i32 = arith.constant 0 : i32
    %c0_i32_0 = arith.constant 0 : i32
    %c0_i32_1 = arith.constant 0 : i32
    return %c0_i32, %c0_i32_0 : i32, i32
  }
  func.func @transform_4(%arg0: i32) -> (i32, i32) {
    %c0_i32 = arith.constant 0 : i32
    %c0_i32_0 = arith.constant 0 : i32
    %c0_i32_1 = arith.constant 0 : i32
    return %c0_i32, %c0_i32_0 : i32, i32
  }
  func.func @transform_5(%arg0: i32) -> (i32, i32) {
    %c0_i32 = arith.constant 0 : i32
    %c0_i32_0 = arith.constant 0 : i32
    %c0_i32_1 = arith.constant 0 : i32
    return %c0_i32, %c0_i32_0 : i32, i32
  }
  func.func @transform_6(%arg0: i32) -> (i32, i32) {
    %c0_i32 = arith.constant 0 : i32
    %c0_i32_0 = arith.constant 0 : i32
    %c0_i32_1 = arith.constant 0 : i32
    return %c0_i32, %c0_i32_0 : i32, i32
  }
  func.func @transform_7(%arg0: i32) -> (i32, i32) {
    %c0_i32 = arith.constant 0 : i32
    %c0_i32_0 = arith.constant 0 : i32
    %c0_i32_1 = arith.constant 0 : i32
    return %c0_i32, %c0_i32_0 : i32, i32
  }
  func.func @transform_8(%arg0: i32) -> (i32, i32, i32) {
    %c0_i32 = arith.constant 0 : i32
    %c0_i32_0 = arith.constant 0 : i32
    %c0_i32_1 = arith.constant 0 : i32
    return %arg0, %c0_i32, %c0_i32_0 : i32, i32, i32
  }
}

</mosaic_0001>

<bundles_post_ra>
// kernel: forward.1
= control target key start
LH: loop header
LB: loop body
LE: loop exit
PB: predicated region body
PF: predicated region fallthrough
CT: control target
= control target key end

     0   :  { %13 = vsyncpa [#allocation7], 0  ;;  %s1320_s27 = smov 0   ;;  %s1582_s0 = inlined_call_operand.vmem [shape: f32[2,16,64], index: 0, kind: input, shape index: {}]   ;;  %s1583_s1 = inlined_call_operand.vmem [shape: f32[2,16,16], index: 1, kind: input, shape index: {}]   ;;  %s1584_s2 = inlined_call_operand.hbm [shape: f32[192,128], index: 2, kind: input, shape index: {}]   ;;  %s1585_s3 = inlined_call_operand.vmem [shape: f32[1,128], index: 3, kind: input, shape index: {}]   ;;  %s1586_s4 = inlined_call_operand.vmem [shape: bf16[16,144], index: 4, kind: input, shape index: {}, may-alias: {4,7}]   ;;  %s1587_s5 = inlined_call_operand.vmem [shape: f32[384,128], index: 5, kind: input, shape index: {}]   ;;  %s1588_s6 = inlined_call_operand.vmem [shape: f32[1,128], index: 6, kind: input, shape index: {}]   ;;  %s1589_s7 = inlined_call_operand.vmem [shape: bf16[16,144], index: 7, kind: input, shape index: {}, may-alias: {4,7}]   ;;  %s1590_s8 = inlined_call_operand.vmem [shape: f32[2,16,128], index: 8, kind: output, shape index: {}]  }
   0x1 LB: > { %s1326_s28 = sadd.s32 4294967295, %s1266_s27   ;;  %p964_p0 = scmp.ge.s32.totalorder %s1266_s27, 1  ;;  %s1266_s27 = sphi %s1320_s27, %s19_s27  }
   0x2   : > { %p228_p1 = scmp.lt.s32.totalorder %s1266_s27, 3  ;;  %s1268_s29 = smov [#allocation6]  }
   0x3   : > { %s240_s30 = sshll.u32 %s1268_s29, 4  ;;  %p1591_p3 = scmp.eq.s32.totalorder %s1326_s28, 0  ;;  %s241_s30 = int_to_ptr.vmem [resolvable:$true] %s240_s30 }
   0x4   : > { %p1330_p2 = pnand %p964_p0, %p228_p1  ;;  %s1228_s13 = scalar_lea.hbm %s1584_s2, 3072 }
   0x5   : > { %p1229_p6 = scmp.ne.s32.totalorder %s1584_s2, %s1228_s13  ;;  %p1235_p10 = scmp.lt.u32.totalorder %s1228_s13, %s1584_s2 }
   0x6   : > { %s1593_s9 = scalar_select %p1330_p2, 1, 0 }
   0x7   : > { %p1193_p4 = pneg %p1330_p2 }
   0x9   : > { %p1339_p5 = pnand %p1591_p3, %p1193_p4 }
   0xb   : > { %p1230_p7 = pneg %p1339_p5 }
   0xd   : > { %p1231_p8 = pnand %p1230_p7, %p1229_p6 }
   0xf   : > { %p1232_p9 = pneg %p1231_p8 }
  0x11   : > { %p1237_p11 = pnand %p1235_p10, %p1232_p9 }
  0x13   : > { %1240 = shalt.err (!%p1237_p11)
}
  0x14   : > { %s1241_s18 = scalar_lea.vmem %s241_s30, 3072  ;;  %p1249_p1 = scmp.lt.s32.totalorder %s241_s30, %s241_s30 }
  0x15   : > { %p1242_p12 = scmp.ne.s32.totalorder %s241_s30, %s1241_s18  ;;  %p1250_p4 = scmp.lt.s32.totalorder %s1241_s18, %s1241_s18 }
  0x17   : > { %p1244_p13 = pnand %p1242_p12, %p1230_p7  ;;  %p1251_p3 = por %p1250_p4, %p1249_p1 }
  0x19   : > { %p1245_p0 = pneg %p1244_p13 }
  0x1b   : > { %p1252_p2 = pnand %p1251_p3, %p1245_p0 }
  0x1d   : > { %1255 = shalt.err (!%p1252_p2)
}
  0x1e   : > { %s1269_s19 = smov 128   ;;  %s1270_s20 = smov 8  }
  0x1f   : > { %1196 = dma.hbm_to_vmem [thread:$0]  (!%p1339_p5), %s1584_s2, 3072, %s241_s30, [#allocation7], %s1269_s19, %s1269_s19, %s1270_s20  }
  0x20   : > { %p1595_p6 = scmp.ne.s32.totalorder %s1593_s9, 0 }
  0x21   : > { %p1596_p8 = scmp.eq.s32.totalorder (!%p1595_p6), %s1326_s28, 0 }
  0x22   : > { %287 = sbr.rel (%p1595_p6) target bundleno = 650 (0x28a), region = 52 }
  0x29   : > { %1261 = dma.done.wait (%p1596_p8), [#allocation7], 3072   ;;  %p1597_p7 = pmov %p1596_p8 }
  0x2a   : > { %p326_p2 = scmp.lt.s32.totalorder %s1326_s28, 1  ;;  %v1271_v0 = vmov 0.0|0.0   ;;  %vm349_vm0 = vcmask 122880   ;;  %v1272_v1 = vmov 0   ;;  %v1273_v2 = vmov 0.0   ;;  %v386_v5 = vld [vmem:[#allocation6] sm:$0xff] }
  0x2b   : > { %1263 = vsyncadd (%p1597_p7), [#allocation7], 4294964224  ;;  %1083 = vmatprep.subr.bf16.mxu0 %v1271_v0  ;;  %548 = vmatprep.mubr.bf16.mxu1 %v1272_v1  ;;  %350 = vst.msk [vmem:[#allocation3] sm:$0x1] %vm349_vm0, %v1273_v2  ;;  %vm346_vm1 = vcmask 516096   ;;  %vm352_vm2 = vcmask 523264  }
  0x2c   : > { %s1599_s28 = smov (!%p326_p2, %s1326_s28), 1  ;;  %351 = vst.msk [vmem:[#allocation3 + $0x11] sm:$0x1] %vm349_vm0, %v1273_v2  ;;  %581 = vst.msk [vmem:[#allocation5] sm:$0x1] %vm349_vm0, %v1273_v2  ;;  %v387_v6 = vld [vmem:[#allocation6 + $0x8] sm:$0xff] }
  0x2d   : > { %582 = vst.msk [vmem:[#allocation5 + $0x11] sm:$0x1] %vm349_vm0, %v1273_v2  ;;  %579 = vst [vmem:[#allocation4] sm:$0x1] %v1273_v2  ;;  %s1377_s23 = sshll.u32 %s1599_s28, 4  ;;  %v388_v7 = vld [vmem:[#allocation6 + $0x10] sm:$0xff]  ;;  %v1084_v9 = vpack.c.bf16 %v387_v6, %v386_v5 }
  0x2e   : > { %580 = vst [vmem:[#allocation4 + $0x11] sm:$0x1] %v1273_v2  ;;  %347 = vst.msk [vmem:[#allocation2] sm:$0x1] %vm346_vm1, %v1273_v2  ;;  %s330_s26 = scalar_lea.vmem %s1582_s0, %s1377_s23  ;;  %v389_v8 = vld [vmem:[#allocation6 + $0x18] sm:$0xff]  ;;  %s335_s30 = scalar_lea.vmem %s1583_s1, %s1377_s23  ;;  %vm355_vm3 = vcmask 130048  }
  0x2f   : > { %348 = vst.msk [vmem:[#allocation2 + $0x11] sm:$0x1] %vm346_vm1, %v1273_v2  ;;  %v342_v3 = vld [vmem:[%s330_s26] sm:$0xff]  ;;  %v343_v4 = vld [vmem:[%s330_s26 + $0x8] sm:$0xff]  ;;  %1085 = vmatpush1.bf16.msra.mxu0 %v1084_v9  ;;  %v1087_v10 = vpack.c.bf16 %v389_v8, %v388_v7  ;;  %s1274_s13 = smov 64   ;;  %v392_v19 = vld [vmem:[#allocation6 + $0x30] sm:$0xff]  ;;  %s340_s20 = scalar_lea.vmem %s1590_s8, %s1377_s23 }
  0x30   : > { %353 = vst.msk [vmem:[#allocation2 + $0x1] sm:$0xff] %vm352_vm2, %v342_v3  ;;  %354 = vst.msk [vmem:[#allocation2 + $0x9] sm:$0xff] %vm352_vm2, %v343_v4  ;;  %v390_v11 = vld [vmem:[#allocation6 + $0x20] sm:$0xff]  ;;  %1086 = vmatprep.subr.bf16.mxu0 %v1271_v0  ;;  %v391_v14 = vld [vmem:[#allocation6 + $0x28] sm:$0xff] }
  0x31   : > { %v1214_v12 = vld [vmem:[%s1586_s4 + $0x4] ss:$8 sps:$4 sm:$0xff]   ;;  %v1216_v13 = vld [vmem:[%s1586_s4] ss:$8 sps:$4 sm:$0xff]   ;;  %v1090_v18 = vpack.c.bf16 %v391_v14, %v390_v11  ;;  %v393_v20 = vld [vmem:[#allocation6 + $0x38] sm:$0xff] }
  0x32   : > { %v344_v15 = vld [vmem:[%s335_s30] sm:$0xff]  ;;  %v345_v16 = vld [vmem:[%s335_s30 + $0x8] sm:$0xff]  ;;  %516 = vmatprep.subr.bf16.mxu1 %v1214_v12  ;;  %v1093_v23 = vpack.c.bf16 %v393_v20, %v392_v19  ;;  %v396_v37 = vld [vmem:[#allocation6 + $0x50] sm:$0xff] }
  0x33   : > { %356 = vst.msk [vmem:[#allocation3 + $0x1] sm:$0xff] %vm355_vm3, %v344_v15  ;;  %357 = vst.msk [vmem:[#allocation3 + $0x9] sm:$0xff] %vm355_vm3, %v345_v16  ;;  %517 = vmatpush1.bf16.msra.mxu1 %v1216_v13  ;;  %1088 = vmatpush1.bf16.msra.mxu0 %v1087_v10  ;;  %v394_v24 = vld [vmem:[#allocation6 + $0x40] sm:$0xff]  ;;  %v395_v25 = vld [vmem:[#allocation6 + $0x48] sm:$0xff] }
  0x34   : > { %1089 = vmatprep.subr.bf16.mxu0 %v1271_v0  ;;  %v1096_v34 = vpack.c.bf16 %v395_v25, %v394_v24  ;;  %v397_v38 = vld [vmem:[#allocation6 + $0x58] sm:$0xff]  ;;  %v398_v41 = vld [vmem:[#allocation6 + $0x60] sm:$0xff]  ;;  %v399_v42 = vld [vmem:[#allocation6 + $0x68] sm:$0xff] }
  0x35   : > { %v1099_v40 = vpack.c.bf16 %v397_v38, %v396_v37  ;;  %v1102_v43 = vpack.c.bf16 %v399_v42, %v398_v41  ;;  %v400_v44 = vld [vmem:[#allocation6 + $0x70] sm:$0xff]  ;;  %v401_v45 = vld [vmem:[#allocation6 + $0x78] sm:$0xff]  ;;  %v402_v47 = vld [vmem:[#allocation6 + $0x80] sm:$0xff] }
  0x36   : > { %v1105_v46 = vpack.c.bf16 %v401_v45, %v400_v44  ;;  %v403_v48 = vld [vmem:[#allocation6 + $0x88] sm:$0xff]  ;;  %v404_v50 = vld [vmem:[#allocation6 + $0x90] sm:$0xff]  ;;  %v405_v51 = vld [vmem:[#allocation6 + $0x98] sm:$0xff] }
  0x37   : > { %v364_v17 = vld [vmem:[#allocation2 + $0x1] sm:$0xff]  ;;  %v365_v21 = vld [vmem:[#allocation2 + $0x9] sm:$0xff]  ;;  %1091 = vmatpush1.bf16.msra.mxu0 %v1090_v18  ;;  %v1108_v49 = vpack.c.bf16 %v403_v48, %v402_v47  ;;  %v1111_v52 = vpack.c.bf16 %v405_v51, %v404_v50  ;;  %v409_v57 = vld [vmem:[#allocation6 + $0xb8] sm:$0xff] }
  0x38   : > { %378 = vrot.lane.b32.xlu0 %v364_v17, %s1274_s13  ;;  %v370_v22 = vld [vmem:[#allocation2 + $0x2] sm:$0xff]  ;;  %1092 = vmatprep.subr.bf16.mxu0 %v1271_v0  ;;  %v408_v56 = vld [vmem:[#allocation6 + $0xb0] sm:$0xff]  ;;  %v624_v7 = vld [vmem:[%s1587_s5 + $0x98] sm:$0xff] }
  0x39   : > { %976 = vmatprep.mubr.msk.f32.mxu0 %vm352_vm2, %v370_v22  ;;  %v406_v53 = vld [vmem:[#allocation6 + $0xa0] sm:$0xff]  ;;  %v407_v54 = vld [vmem:[#allocation6 + $0xa8] sm:$0xff]  ;;  %v1117_v58 = vpack.c.bf16 %v409_v57, %v408_v56  ;;  %v623_v6 = vld [vmem:[%s1587_s5 + $0x90] sm:$0xff] }
  0x3a   : > { %v360_v26 = vld [vmem:[#allocation3] sm:$0xff]  ;;  %v361_v27 = vld [vmem:[#allocation3 + $0x8] sm:$0xff]  ;;  %v1114_v55 = vpack.c.bf16 %v407_v54, %v406_v53  ;;  %v371_v60 = vld [vmem:[#allocation2 + $0xa] sm:$0xff]  ;;  %v1123_v10 = vpack.c.bf16 %v624_v7, %v623_v6 }
  0x3b   : > { %v366_v28 = vld [vmem:[#allocation3 + $0x1] sm:$0xff]  ;;  %v367_v29 = vld [vmem:[#allocation3 + $0x9] sm:$0xff]  ;;  %1094 = vmatpush1.bf16.msra.mxu0 %v1093_v23  ;;  %v607_v13 = vld [vmem:[%s1587_s5 + $0x10] sm:$0xff] }
  0x3c   : > { %380 = vrot.lane.b32.xlu0 %v365_v21, %s1274_s13  ;;  %v368_v30 = vadd.f32 %v366_v28, %v360_v26  ;;  %v372_v31 = vld [vmem:[#allocation3 + $0x2] sm:$0xff]  ;;  %v373_v32 = vld [vmem:[#allocation3 + $0xa] sm:$0xff]  ;;  %v369_v33 = vadd.f32 %v367_v29, %v361_v27  ;;  %1095 = vmatprep.subr.bf16.mxu0 %v1271_v0  ;;  %v627_v23 = vld [vmem:[%s1587_s5 + $0xb0] sm:$0xff] }
  0x3d   : > { %v358_v59 = vld [vmem:[#allocation2] sm:$0xff]  ;;  %v622_v62 = vld [vmem:[%s1587_s5 + $0x88] sm:$0xff]  ;;  %v608_v14 = vld [vmem:[%s1587_s5 + $0x18] sm:$0xff] }
  0x3e   : > { %v374_v35 = vadd.f32 %v372_v31, %v368_v30  ;;  %v375_v36 = vadd.f32 %v373_v32, %v369_v33  ;;  %v621_v61 = vld [vmem:[%s1587_s5 + $0x80] sm:$0xff]  ;;  %v359_v4 = vld [vmem:[#allocation2 + $0x8] sm:$0xff]  ;;  %v1125_v17 = vpack.c.bf16 %v608_v14, %v607_v13  ;;  %v628_v24 = vld [vmem:[%s1587_s5 + $0xb8] sm:$0xff] }
  0x3f   : > { %1097 = vmatpush1.bf16.msra.mxu0 %v1096_v34  ;;  %v605_v63 = vld [vmem:[%s1587_s5] sm:$0xff]  ;;  %v1119_v5 = vpack.c.bf16 %v622_v62, %v621_v61  ;;  %v626_v16 = vld [vmem:[%s1587_s5 + $0xa8] sm:$0xff]  ;;  %v1131_v26 = vpack.c.bf16 %v628_v24, %v627_v23  ;;  %v611_v27 = vld [vmem:[%s1587_s5 + $0x30] sm:$0xff] }
  0x40   : > { %v500_v39 = vpack.c.bf16 %v375_v36, %v374_v35  ;;  %1098 = vmatprep.subr.bf16.mxu0 %v1271_v0  ;;  %v1217_v11 = vld [vmem:[%s1589_s7] ss:$8 sps:$4 sm:$0xff]   ;;  %v1219_v12 = vld [vmem:[%s1589_s7 + $0x4] ss:$8 sps:$4 sm:$0xff]   ;;  %v612_v28 = vld [vmem:[%s1587_s5 + $0x38] sm:$0xff] }
  0x41   : > { %1120 = vmatprep.subr.bf16.mxu1 %v1119_v5  ;;  %v625_v15 = vld [vmem:[%s1587_s5 + $0xa0] sm:$0xff]  ;;  %v610_v21 = vld [vmem:[%s1587_s5 + $0x28] sm:$0xff]  ;;  %v631_v35 = vld [vmem:[%s1587_s5 + $0xd0] sm:$0xff] }
  0x42   : > { %980 = vmatmul.mubr.msk.bf16.vlgmr.msra.gmra.mrb[0].mxu1 %vm355_vm3, %v500_v39  ;;  %v1127_v19 = vpack.c.bf16 %v626_v16, %v625_v15  ;;  %v609_v20 = vld [vmem:[%s1587_s5 + $0x20] sm:$0xff]  ;;  %v630_v30 = vld [vmem:[%s1587_s5 + $0xc8] sm:$0xff]  ;;  %v632_v36 = vld [vmem:[%s1587_s5 + $0xd8] sm:$0xff] }
  0x43   : > { %1100 = vmatpush1.bf16.msra.mxu0 %v1099_v40  ;;  %v1129_v25 = vpack.c.bf16 %v610_v21, %v609_v20  ;;  %v629_v29 = vld [vmem:[%s1587_s5 + $0xc0] sm:$0xff]  ;;  %v614_v33 = vld [vmem:[%s1587_s5 + $0x48] sm:$0xff]  ;;  %v1139_v37 = vpack.c.bf16 %v632_v36, %v631_v35  ;;  %v615_v38 = vld [vmem:[%s1587_s5 + $0x50] sm:$0xff] }
  0x44   : > { %1101 = vmatprep.subr.bf16.mxu0 %v1271_v0  ;;  %v1135_v31 = vpack.c.bf16 %v630_v30, %v629_v29  ;;  %v613_v32 = vld [vmem:[%s1587_s5 + $0x40] sm:$0xff]  ;;  %v616_v39 = vld [vmem:[%s1587_s5 + $0x58] sm:$0xff]  ;;  %v634_v42 = vld [vmem:[%s1587_s5 + $0xe8] sm:$0xff] }
  0x45   : > { %v1137_v34 = vpack.c.bf16 %v614_v33, %v613_v32  ;;  %v1141_v40 = vpack.c.bf16 %v616_v39, %v615_v38  ;;  %v633_v41 = vld [vmem:[%s1587_s5 + $0xe0] sm:$0xff]  ;;  %v618_v45 = vld [vmem:[%s1587_s5 + $0x68] sm:$0xff]  ;;  %v635_v47 = vld [vmem:[%s1587_s5 + $0xf0] sm:$0xff] }
  0x46   : > { %v617_v44 = vld [vmem:[%s1587_s5 + $0x60] sm:$0xff]  ;;  %v636_v48 = vld [vmem:[%s1587_s5 + $0xf8] sm:$0xff]  ;;  %v619_v50 = vld [vmem:[%s1587_s5 + $0x70] sm:$0xff] }
  0x47   : > { %1103 = vmatpush1.bf16.msra.mxu0 %v1102_v43  ;;  %v1143_v43 = vpack.c.bf16 %v634_v42, %v633_v41  ;;  %v620_v51 = vld [vmem:[%s1587_s5 + $0x78] sm:$0xff]  ;;  %v637_v53 = vld [vmem:[%s1587_s5 + $0x100] sm:$0xff]  ;;  %v638_v54 = vld [vmem:[%s1587_s5 + $0x108] sm:$0xff] }
  0x48   : > { %1104 = vmatprep.subr.bf16.mxu0 %v1271_v0  ;;  %v975_v16 = vld [vmem:[%s1585_s3] ss:$0 sm:$0xff]  ;;  %v642_v35 = vld [vmem:[%s1587_s5 + $0x128] sm:$0xff] }
  0x49   : > { %v645_v42 = vld [vmem:[%s1587_s5 + $0x140] sm:$0xff] }
  0x4b   : > { %1106 = vmatpush1.bf16.msra.mxu0 %v1105_v46  ;;  %v1145_v46 = vpack.c.bf16 %v618_v45, %v617_v44  ;;  %v647_v45 = vld [vmem:[%s1587_s5 + $0x150] sm:$0xff] }
  0x4c   : > { %1107 = vmatprep.subr.bf16.mxu0 %v1271_v0 }
  0x4f   : > { %1109 = vmatpush1.bf16.msra.mxu0 %v1108_v49  ;;  %v1147_v49 = vpack.c.bf16 %v636_v48, %v635_v47  ;;  %v649_v48 = vld [vmem:[%s1587_s5 + $0x160] sm:$0xff] }
  0x50   : > { %1110 = vmatprep.subr.bf16.mxu0 %v1271_v0 }
  0x53   : > { %1112 = vmatpush1.bf16.msra.mxu0 %v1111_v52  ;;  %v1149_v52 = vpack.c.bf16 %v620_v51, %v619_v50  ;;  %v651_v51 = vld [vmem:[%s1587_s5 + $0x170] sm:$0xff] }
  0x54   : > { %1113 = vmatprep.subr.bf16.mxu0 %v1271_v0 }
  0x57   : > { %1115 = vmatpush1.bf16.msra.mxu0 %v1114_v55  ;;  %v1151_v55 = vpack.c.bf16 %v638_v54, %v637_v53 }
  0x58   : > { %1116 = vmatprep.subr.bf16.mxu0 %v1271_v0  ;;  %v606_v0 = vld [vmem:[%s1587_s5 + $0x8] sm:$0xff] }
  0x59   : > { %v1121_v9 = vpack.c.bf16 %v606_v0, %v605_v63 }
  0x5b   : > { %1118 = vmatpush1.bf16.msra.mxu0 %v1117_v58  ;;  %1122 = vmatpush3.bf16.msra.mxu1 %v1121_v9 }
  0x5c   : > { %1124 = vmatprep.subr.bf16.mxu1 %v1123_v10  ;;  %828 = vmatprep.subr.bf16.mxu0 %v1219_v12 }
  0x5f   : > { %1126 = vmatpush3.bf16.msra.mxu1 %v1125_v17 }
  0x60   : > { %1128 = vmatprep.subr.bf16.mxu1 %v1127_v19 }
  0x63   : > { %1130 = vmatpush3.bf16.msra.mxu1 %v1129_v25 }
  0x64   : > { %1132 = vmatprep.subr.bf16.mxu1 %v1131_v26 }
  0xaa   : > { %v379_v3 = vpop.permute.xlu0 %378 }
  0xab   : > { %v384_v8 = vsel %vm352_vm2, %v358_v59, %v379_v3 }
  0xac   : > { %488 = vmatmul.mubr.f32.vlgmr.msra.gmra.mrb[0].mxu0 %v384_v8 }
  0xad   : > { %977 = vmatprep.mubr.msk.f32.mxu0 %vm352_vm2, %v371_v60  ;;  %829 = vmatpush1.bf16.msra.mxu0 %v1217_v11 }
  0xae   : > { %v381_v18 = vpop.permute.xlu0 %380 }
  0xaf   : > { %v385_v22 = vsel %vm352_vm2, %v359_v4, %v381_v18 }
  0xb0   : > { %493 = vmatmul.mubr.f32.gmra.mrb[2].mxu0 %v385_v22 }
  0xb1   : > { %860 = vmatprep.mubr.bf16.mxu0 %v1272_v1  ;;  %v1133_v1 = vpack.c.bf16 %v612_v28, %v611_v27 }
  0xb3   : > { %1134 = vmatpush3.bf16.msra.mxu1 %v1133_v1  ;;  %v639_v1 = vld [vmem:[%s1587_s5 + $0x110] sm:$0xff] }
  0xb4   : > { %1136 = vmatprep.subr.bf16.mxu1 %v1135_v31  ;;  %v640_v31 = vld [vmem:[%s1587_s5 + $0x118] sm:$0xff] }
  0xb5   : > { %v1155_v32 = vpack.c.bf16 %v640_v31, %v639_v1 }
  0xb7   : > { %1138 = vmatpush3.bf16.msra.mxu1 %v1137_v34  ;;  %v641_v34 = vld [vmem:[%s1587_s5 + $0x120] sm:$0xff] }
  0xb8   : > { %1140 = vmatprep.subr.bf16.mxu1 %v1139_v37  ;;  %v1159_v36 = vpack.c.bf16 %v642_v35, %v641_v34  ;;  %v643_v37 = vld [vmem:[%s1587_s5 + $0x130] sm:$0xff] }
  0xbb   : > { %1142 = vmatpush3.bf16.msra.mxu1 %v1141_v40  ;;  %v644_v40 = vld [vmem:[%s1587_s5 + $0x138] sm:$0xff] }
  0xbc   : > { %1144 = vmatprep.subr.bf16.mxu1 %v1143_v43  ;;  %v1163_v41 = vpack.c.bf16 %v644_v40, %v643_v37  ;;  %v646_v43 = vld [vmem:[%s1587_s5 + $0x148] sm:$0xff] }
  0xbd   : > { %v1167_v44 = vpack.c.bf16 %v646_v43, %v645_v42 }
  0xbf   : > { %1146 = vmatpush3.bf16.msra.mxu1 %v1145_v46  ;;  %v648_v46 = vld [vmem:[%s1587_s5 + $0x158] sm:$0xff] }
  0xc0   : > { %1148 = vmatprep.subr.bf16.mxu1 %v1147_v49  ;;  %v1171_v47 = vpack.c.bf16 %v648_v46, %v647_v45  ;;  %v650_v49 = vld [vmem:[%s1587_s5 + $0x168] sm:$0xff] }
  0xc1   : > { %v1175_v50 = vpack.c.bf16 %v650_v49, %v649_v48 }
  0xc3   : > { %1150 = vmatpush3.bf16.msra.mxu1 %v1149_v52  ;;  %v652_v52 = vld [vmem:[%s1587_s5 + $0x178] sm:$0xff] }
  0xc4   : > { %1152 = vmatprep.subr.bf16.mxu1 %v1151_v55  ;;  %v1179_v53 = vpack.c.bf16 %v652_v52, %v651_v51 }
 0x115   : > { %v550_v56 = vpop.f32.mrb[0].mxu1 }
 0x116   : > { %v552_v57 = vpop.f32.mrb[1].mxu1  ;;  %v1183_v13 = vround.rtne.f32 %v550_v56 }
 0x117   : > { %v1184_v58 = vround.rtne.f32 %v552_v57  ;;  %v554_v59 = vpop.f32.mrb[2].mxu1 }
 0x118   : > { %v556_v60 = vpop.f32.mrb[3].mxu1  ;;  %v565_v14 = vmax.f32 %v1183_v13, 1.0  ;;  %v1185_v15 = vround.rtne.f32 %v554_v59  ;;  %vm563_vm6 = vcmp.gt.f32.partialorder %v1183_v13, 0.0 }
 0x119   : > { %vm573_vm4 = vcmp.gt.f32.partialorder %v1184_v58, 0.0  ;;  %v1186_v61 = vround.rtne.f32 %v556_v60 }
 0x11a   : > { %v981_v62 = vsel %vm573_vm4, 1.0, %v1273_v2  ;;  %1220 = vrcp.f32 %v565_v14  ;;  %vm564_vm7 = vcmp.gt.f32.partialorder %v1185_v15, 0.0 }
 0x11b   : > { %585 = vst.msk [vmem:[#allocation5 + $0x1] sm:$0xff] %vm355_vm3, %v981_v62  ;;  %vm574_vm5 = vcmp.gt.f32.partialorder %v1186_v61, 0.0 }
 0x11c   : > { %v982_v63 = vsel %vm574_vm5, 1.0, %v1273_v2  ;;  %v566_v2 = vmax.f32 %v1185_v15, 1.0 }
 0x11d   : > { %586 = vst.msk [vmem:[#allocation5 + $0x9] sm:$0xff] %vm355_vm3, %v982_v63 }
 0x11e   : > { %1222 = vrcp.f32 %v566_v2 }
 0x122   : > { %v589_v3 = vld [vmem:[#allocation5] sm:$0xff] }
 0x123   : > { %v595_v4 = vld [vmem:[#allocation5 + $0x1] sm:$0xff] }
 0x124   : > { %v597_v5 = vadd.f32 %v595_v4, %v589_v3  ;;  %v590_v0 = vld [vmem:[#allocation5 + $0x8] sm:$0xff]  ;;  %v1221_v18 = vpop.eup %1220 }
 0x125   : > { %v596_v6 = vld [vmem:[#allocation5 + $0x9] sm:$0xff]  ;;  %v569_v22 = vsel %vm563_vm6, %v1221_v18, 0.0 }
 0x126   : > { %v601_v7 = vld [vmem:[#allocation5 + $0x2] sm:$0xff]  ;;  %v598_v8 = vadd.f32 %v596_v6, %v590_v0  ;;  %v602_v9 = vld [vmem:[#allocation5 + $0xa] sm:$0xff] }
 0x127   : > { %v603_v10 = vadd.f32 %v601_v7, %v597_v5  ;;  %v983_v7 = vld [vmem:[%s1588_s6] ss:$0 sm:$0xff] }
 0x128   : > { %v604_v11 = vadd.f32 %v602_v9, %v598_v8  ;;  %v1223_v24 = vpop.eup %1222 }
 0x129   : > { %v570_v29 = vsel %vm564_vm7, %v1223_v24, 0.0 }
 0x12a   : > { %v812_v12 = vpack.c.bf16 %v604_v11, %v603_v10 }
 0x12c   : > { %986 = vmatmul.mubr.msk.bf16.vlgmr.msra.gmra.mrb[4].mxu0 %vm355_vm3, %v812_v12 }
 0x17f   : > { %v489_v17 = vpop.f32.mrb[0].mxu0 }
 0x180   : > { %v490_v19 = vadd.f32 %v975_v16, %v489_v17  ;;  %v491_v20 = vpop.f32.mrb[1].mxu0 }
 0x182   : > { %v498_v21 = vmax.f32 %v490_v19, 0.0 }
 0x183   : > { %v494_v23 = vpop.f32.mrb[2].mxu0 }
 0x184   : > { %v571_v25 = vmul.f32 %v569_v22, %v498_v21  ;;  %v495_v26 = vadd.f32 %v975_v16, %v494_v23  ;;  %v496_v27 = vpop.f32.mrb[3].mxu0 }
 0x186   : > { %583 = vst [vmem:[#allocation4 + $0x1] sm:$0xff] %v571_v25  ;;  %v499_v28 = vmax.f32 %v495_v26, 0.0  ;;  %724 = vmatprep.mubr.f32.mxu1 %v571_v25 }
 0x188   : > { %v572_v30 = vmul.f32 %v570_v29, %v499_v28 }
 0x18a   : > { %584 = vst [vmem:[#allocation4 + $0x9] sm:$0xff] %v572_v30 }
 0x18d   : > { %v587_v33 = vld [vmem:[#allocation4] sm:$0xff] }
 0x18e   : > { %725 = vmatmul.mubr.f32.vlgmr.msra.gmra.mrb[4].mxu1 %v587_v33 }
 0x18f   : > { %1154 = vmatpush3.bf16.msra.mxu1 %v1151_v55  ;;  %729 = vmatprep.mubr.f32.mxu1 %v572_v30 }
 0x190   : > { %1156 = vmatprep.subr.bf16.mxu1 %v1155_v32 }
 0x191   : > { %v588_v38 = vld [vmem:[#allocation4 + $0x8] sm:$0xff] }
 0x192   : > { %v599_v39 = vld [vmem:[#allocation4 + $0x2] sm:$0xff]  ;;  %730 = vmatmul.mubr.f32.gmra.mrb[6].mxu1 %v588_v38  ;;  %v600_v54 = vld [vmem:[#allocation4 + $0xa] sm:$0xff] }
 0x193   : > { %1158 = vmatpush3.bf16.msra.mxu1 %v1155_v32  ;;  %1080 = vmatprep.mubr.f32.mxu1 %v599_v39 }
 0x194   : > { %1160 = vmatprep.subr.bf16.mxu1 %v1159_v36 }
 0x197   : > { %1162 = vmatpush3.bf16.msra.mxu1 %v1159_v36 }
 0x198   : > { %1164 = vmatprep.subr.bf16.mxu1 %v1163_v41 }
 0x19b   : > { %1166 = vmatpush3.bf16.msra.mxu1 %v1163_v41 }
 0x19c   : > { %1168 = vmatprep.subr.bf16.mxu1 %v1167_v44 }
 0x19f   : > { %1170 = vmatpush3.bf16.msra.mxu1 %v1167_v44 }
 0x1a0   : > { %1172 = vmatprep.subr.bf16.mxu1 %v1171_v47 }
 0x1a3   : > { %1174 = vmatpush3.bf16.msra.mxu1 %v1171_v47 }
 0x1a4   : > { %1176 = vmatprep.subr.bf16.mxu1 %v1175_v50 }
 0x1a7   : > { %1178 = vmatpush3.bf16.msra.mxu1 %v1175_v50 }
 0x1a8   : > { %1180 = vmatprep.subr.bf16.mxu1 %v1179_v53 }
 0x1ab   : > { %1182 = vmatpush3.bf16.msra.mxu1 %v1179_v53 }
 0x1ae   : > { %1081 = vmatmul.mubr.f32.vlgmr.msra.gmra.mrb[8].mxu1 %v600_v54 }
 0x1ff   : > { %v862_v55 = vpop.f32.mrb[4].mxu0 }
 0x200   : > { %v864_v56 = vpop.f32.mrb[5].mxu0  ;;  %v1187_v5 = vround.rtne.f32 %v862_v55 }
 0x201   : > { %v865_v57 = vpop.f32.mrb[6].mxu0 }
 0x202   : > { %v867_v58 = vpop.f32.mrb[7].mxu0  ;;  %v1188_v4 = vround.rtne.f32 %v865_v57  ;;  %v873_v6 = vmax.f32 %v1187_v5, 1.0  ;;  %vm871_vm9 = vcmp.gt.f32.partialorder %v1187_v5, 0.0 }
 0x204   : > { %v874_v0 = vmax.f32 %v1188_v4, 1.0  ;;  %vm872_vm8 = vcmp.gt.f32.partialorder %v1188_v4, 0.0 }
 0x206   : > { %1224 = vrcp.f32 %v874_v0 }
 0x207   : > { %1226 = vrcp.f32 %v873_v6 }
 0x210   : > { %v1225_v11 = vpop.eup %1224 }
 0x211   : > { %v1227_v14 = vpop.eup %1226  ;;  %v878_v16 = vsel %vm872_vm8, %v1225_v11, 0.0 }
 0x212   : > { %v877_v18 = vsel %vm871_vm9, %v1227_v14, 0.0 }
 0x261   : > { %v1024_v59 = vpop.f32.mrb[4].mxu1 }
 0x262   : > { %v1025_v60 = vpop.f32.mrb[5].mxu1 }
 0x263   : > { %v1026_v61 = vadd.f32 %v1025_v60, %v1024_v59 }
 0x265   : > { %v1027_v62 = vpop.f32.mrb[6].mxu1  ;;  %v727_v10 = vadd.f32 %v1026_v61, %v983_v7 }
 0x266   : > { %v1028_v63 = vpop.f32.mrb[7].mxu1 }
 0x267   : > { %v1029_v3 = vadd.f32 %v1028_v63, %v1027_v62 }
 0x269   : > { %v732_v8 = vadd.f32 %v1029_v3, %v983_v7 }
 0x281   : > { %v1082_v9 = vpop.f32.mrb[8].mxu1 }
 0x282   : > { %v807_v12 = vadd.f32 %v1082_v9, %v732_v8  ;;  %v801_v13 = vpop.f32.mrb[9].mxu1 }
 0x283   : > { %v802_v15 = vadd.f32 %v801_v13, %v727_v10 }
 0x284   : > { %v811_v2 = vmax.f32 %v807_v12, 0.0 }
 0x285   : > { %v810_v17 = vmax.f32 %v802_v15, 0.0 }
 0x286   : > { %v880_v19 = vmul.f32 %v878_v16, %v811_v2 }
 0x287   : > { %v879_v20 = vmul.f32 %v877_v18, %v810_v17 }
 0x288   : > { %882 = vst [vmem:[%s340_s20 + $0x8] sm:$0xff] %v880_v19 }
 0x289   : > { %881 = vst [vmem:[%s340_s20] sm:$0xff] %v879_v20 }
 0x28a PF: > { %s19_s27 = sadd.s32 1, %s1266_s27  }
 0x28b   : > { %p16_p3 = scmp.ge.s32.totalorder %s19_s27, 4  }
 0x28d   :  { %18 = sbr.rel (!%p16_p3) target bundleno = 1 (0x1), region = 90 }
 0x294   :  { %904 = vsyncpa [#allocation7], 1 }
 0x295   :  { %906 = vsyncpa [#allocation7 + $0x1], 1 }

</bundles_post_ra>
